<compile_context>
chip_gen: v6e
topology: v6e:2x2x1
jax: 0.10.0
libtpu: 0.0.40
codegen_flags: <defaults>
</compile_context>

<pallas_src>
import functools

import jax
import jax.numpy as jnp
from jax import lax
from jax.experimental import pallas as pl
from jax.experimental.pallas import tpu as pltpu


def _regression_kernel(*refs, n, tm, lambd, two_way, use_eye, mxu_dtype):
    if use_eye:
        (x1_ref, x2_ref, loss_ref, xn2_s, acc_pos, acc_diag2, acc_s2) = refs
    elif two_way:
        (x1_ref, x2_ref, pos_ref, posT_ref, loss_ref, xn2_s, acc1,
         col_s2, col_s2m, col_sm, col_np) = refs
    else:
        (x1_ref, x2_ref, pos_ref, loss_ref, xn2_s, acc1) = refs

    i = pl.program_id(0)
    last = pl.num_programs(0) - 1
    lam = jnp.float32(lambd)
    nf = jnp.float32(n)
    eps2 = jnp.float32(1e-24)   # F.normalize: v/max(||v||,1e-12) == v*rsqrt(max(||v||^2,1e-24))

    @pl.when(i == 0)
    def _init():
        x2 = x2_ref[...].astype(jnp.float32)
        inv2 = lax.rsqrt(jnp.maximum(jnp.sum(x2 * x2, axis=-1, keepdims=True), eps2))
        xn2_s[...] = x2 * inv2                    # normalized once, kept in f32 scratch
        if use_eye:
            acc_pos[...] = jnp.zeros_like(acc_pos)
            acc_diag2[...] = jnp.zeros_like(acc_diag2)
            acc_s2[...] = jnp.zeros_like(acc_s2)
        else:
            acc1[...] = jnp.zeros_like(acc1)
            if two_way:
                col_s2[...] = jnp.zeros_like(col_s2)
                col_s2m[...] = jnp.zeros_like(col_s2m)
                col_sm[...] = jnp.zeros_like(col_sm)
                col_np[...] = jnp.zeros_like(col_np)

    x1 = x1_ref[...].astype(jnp.float32)
    inv1 = lax.rsqrt(jnp.maximum(jnp.sum(x1 * x1, axis=-1, keepdims=True), eps2))
    xn1_f32 = x1 * inv1

    # Single MXU matmul per row tile: S_tile = xn1 @ xn2.T (last-dim contraction,
    # no transposed operand feed, f32 accumulation).
    contract = (((1,), (1,)), ((), ()))
    s = lax.dot_general(xn1_f32.astype(mxu_dtype), xn2_s[...].astype(mxu_dtype),
                        dimension_numbers=contract,
                        preferred_element_type=jnp.float32)        # (tm, n)
    s2 = s * s
    row_s2 = jnp.sum(s2, axis=1, keepdims=True)                    # (tm, 1)

    if use_eye:
        # Mask-free identity path: diag(S) from the operands in f32 (precision-safe
        # even with bf16 MXU operands). num_pos == 1, num_neg == n-1, and the
        # transposed direction is analytically identical (row sums == col sums).
        start = pl.multiple_of(i * tm, tm)
        xn2_rows = xn2_s[pl.ds(start, tm), :]                      # (tm, d) f32
        diag = jnp.sum(xn1_f32 * xn2_rows, axis=1, keepdims=True)  # (tm, 1)
        acc_pos[...] += jnp.sum((diag - 1.0) ** 2, axis=0, keepdims=True)
        acc_diag2[...] += jnp.sum(diag * diag, axis=0, keepdims=True)
        acc_s2[...] += jnp.sum(row_s2, axis=0, keepdims=True)

        @pl.when(i == last)
        def _fin_eye():
            pos_loss = acc_pos[...] / nf
            neg_loss = (acc_s2[...] - acc_diag2[...]) / (nf * (nf - 1.0))
            loss_ref[...] = pos_loss + lam * neg_loss              # two_way == one_way here
    else:
        mask = pos_ref[...].astype(jnp.float32)                    # (tm, n), 0/1 from int8
        sm = s * mask
        s2m = s2 * mask
        num_pos = jnp.sum(mask, axis=1, keepdims=True)             # (tm, 1)
        num_neg = nf - num_pos
        row_s2m = jnp.sum(s2m, axis=1, keepdims=True)
        row_sm = jnp.sum(sm, axis=1, keepdims=True)
        pos_row = row_s2m - 2.0 * row_sm + num_pos                 # sum((S-1)^2 * m)
        neg_row = row_s2 - row_s2m                                 # sum(S^2 * (1-m))
        per_row = pos_row / num_pos + lam * (neg_row / num_neg)
        acc1[...] += jnp.sum(per_row, axis=0, keepdims=True)

        if two_way:
            # Transposed direction via column reductions of the SAME S tile
            # against mask.T (no second matmul, no S.T buffer).
            maskT = posT_ref[...].astype(jnp.float32)              # rows of pos.T
            col_s2[...] += jnp.sum(s2, axis=0, keepdims=True)
            col_s2m[...] += jnp.sum(s2 * maskT, axis=0, keepdims=True)
            col_sm[...] += jnp.sum(s * maskT, axis=0, keepdims=True)
            col_np[...] += jnp.sum(maskT, axis=0, keepdims=True)

        @pl.when(i == last)
        def _fin():
            loss1 = acc1[...] / nf
            if two_way:
                npos = col_np[...]                                 # (1, n) == num_pos
                nneg = nf - npos
                pos_col = col_s2m[...] - 2.0 * col_sm[...] + npos
                neg_col = col_s2[...] - col_s2m[...]
                per_col = pos_col / npos + lam * (neg_col / nneg)
                loss2 = jnp.sum(per_col, axis=1, keepdims=True) / nf
                loss_ref[...] = (loss1 + loss2) * 0.5
            else:
                loss_ref[...] = loss1


def _vmem_limit_bytes() -> int:
    # Generation-aware VMEM budget (v7x has only 64 MiB per TC).
    try:
        cap = int(pltpu.get_tpu_info().vmem_capacity_bytes)
        return min(max(cap // 2, 32 * 1024 * 1024), 96 * 1024 * 1024)
    except Exception:
        return 32 * 1024 * 1024


def _pick_tile(n: int, has_mask: bool) -> int:
    # Prefer 256-row tiles (v6e/v7x 256-wide MXU), then 128 (v5e native), then smaller.
    # With an int8 mask input keep the sublane dim a multiple of 32 (packed tiling).
    candidates = (256, 128, 64, 32) if has_mask else (256, 128, 64, 32, 16, 8)
    for tm in candidates:
        if n % tm == 0 and n >= tm:
            return tm
    return n


def regression_loss(x1, x2, pos_mat=None, *, lambd, two_way=True,
                    mxu_dtype=jnp.float32, tm=None):
    """Pallas implementation of Regression.forward."""
    n, d = x1.shape
    assert x2.shape == (n, d)
    use_eye = pos_mat is None

    if tm is None:
        tm = _pick_tile(n, has_mask=not use_eye)
    assert n % tm == 0, "row-tile size must divide n"
    steps = n // tm

    kernel = functools.partial(
        _regression_kernel, n=n, tm=tm, lambd=float(lambd),
        two_way=bool(two_way), use_eye=use_eye, mxu_dtype=mxu_dtype)

    in_arrays = [x1, x2]
    in_specs = [
        pl.BlockSpec((tm, d), lambda i: (i, 0)),    # x1 row tile (pipelined DMA)
        pl.BlockSpec((n, d), lambda i: (0, 0)),     # x2 resident (constant block index)
    ]
    mask_bytes = 0
    if not use_eye:
        pos = (jnp.asarray(pos_mat) != 0).astype(jnp.int8)   # 1-byte mask DMA
        in_arrays.append(pos)
        in_specs.append(pl.BlockSpec((tm, n), lambda i: (i, 0)))
        mask_bytes = n * n
        if two_way:
            in_arrays.append(pos.T)                          # tiny; lets S be reused for S.T
            in_specs.append(pl.BlockSpec((tm, n), lambda i: (i, 0)))
            mask_bytes *= 2

    scratch = [pltpu.VMEM((n, d), jnp.float32)]              # normalized x2 (step-0 fill)
    if use_eye:
        scratch += [pltpu.VMEM((1, 1), jnp.float32)] * 3     # acc_pos, acc_diag2, acc_s2
    else:
        scratch += [pltpu.VMEM((1, 1), jnp.float32)]         # direction-1 scalar acc
        if two_way:
            scratch += [pltpu.VMEM((1, n), jnp.float32)] * 4  # col S^2 / S^2*mT / S*mT / npos

    cost = pl.CostEstimate(
        flops=2 * n * n * d + (10 if (two_way and not use_eye) else 6) * n * n + 8 * n * d,
        transcendentals=2 * n,
        bytes_accessed=(x1.size * x1.dtype.itemsize + x2.size * x2.dtype.itemsize
                        + mask_bytes + 4),
    )

    out = pl.pallas_call(
        kernel,
        out_shape=jax.ShapeDtypeStruct((1, 1), jnp.float32),
        grid_spec=pltpu.PrefetchScalarGridSpec(
            num_scalar_prefetch=0,
            grid=(steps,),
            in_specs=in_specs,
            out_specs=pl.BlockSpec((1, 1), lambda i: (0, 0)),
            scratch_shapes=scratch),
        compiler_params=pltpu.CompilerParams(
            dimension_semantics=("arbitrary",),   # accumulators carried across row tiles
            vmem_limit_bytes=_vmem_limit_bytes()),
        cost_estimate=cost,
    )(*in_arrays)
    return out[0, 0]


def _reference(x1, x2, pos_mat, lambd, two_way=True):
    # Plain-JAX reference of the same forward pass (silent check).
    n = x1.shape[0]
    pos = jnp.eye(n, dtype=bool) if pos_mat is None else pos_mat.astype(bool)
    eps = 1e-12
    xn1 = x1 / jnp.maximum(jnp.linalg.norm(x1, axis=-1, keepdims=True), eps)
    xn2 = x2 / jnp.maximum(jnp.linalg.norm(x2, axis=-1, keepdims=True), eps)
    s = xn1 @ xn2.T
    num_pos = pos.sum(1)
    num_neg = n - num_pos

    def one(sm):
        pos_loss = (jnp.where(pos, (sm - 1.0) ** 2, 0.0).sum(1) / num_pos).mean()
        neg_loss = (jnp.where(pos, 0.0, sm ** 2).sum(1) / num_neg).mean()
        return pos_loss + lambd * neg_loss

    loss = one(s)
    if two_way:
        loss = (loss + one(s.T)) * 0.5
    return loss


if __name__ == "__main__":
    lambd = 0.5
    key = jax.random.PRNGKey(0)
    k1, k2, k3, k4 = jax.random.split(key, 4)

    # 1) default pos_mat=None (mask-free eye path), two_way, multi-tile grid (16/8 = 2 steps)
    n, d = 16, 32
    x1 = jax.random.normal(k1, (n, d), dtype=jnp.float32)
    x2 = jax.random.normal(k2, (n, d), dtype=jnp.float32)
    loss_a = regression_loss(x1, x2, pos_mat=None, lambd=lambd, two_way=True, tm=8)
    jax.block_until_ready(loss_a)
    ref_a = _reference(x1, x2, None, lambd, True)
    assert jnp.allclose(loss_a, ref_a, atol=1e-5, rtol=1e-5), (loss_a, ref_a)

    # 2) explicit asymmetric pos_mat (int8 path), two_way, multi-tile grid (64/32 = 2 steps)
    n2, d2 = 64, 32
    y1 = jax.random.normal(k3, (n2, d2), dtype=jnp.float32)
    y2 = jax.random.normal(k4, (n2, d2), dtype=jnp.float32)
    eye = jnp.eye(n2, dtype=bool)
    extra = jnp.roll(eye, 1, axis=1) & (jnp.arange(n2)[:, None] % 2 == 0)
    pos_mat = eye | extra
    loss_b = regression_loss(y1, y2, pos_mat=pos_mat, lambd=lambd, two_way=True, tm=32)
    jax.block_until_ready(loss_b)
    ref_b = _reference(y1, y2, pos_mat, lambd, True)
    assert jnp.allclose(loss_b, ref_b, atol=1e-5, rtol=1e-5), (loss_b, ref_b)

    # 3) one-way variant with pos_mat, multi-tile
    loss_c = regression_loss(y1, y2, pos_mat=pos_mat, lambd=lambd, two_way=False, tm=32)
    jax.block_until_ready(loss_c)
    ref_c = _reference(y1, y2, pos_mat, lambd, False)
    assert jnp.allclose(loss_c, ref_c, atol=1e-5, rtol=1e-5), (loss_c, ref_c)

    # 4) bf16 MXU operands (f32 accumulate) — looser tolerance, eye path
    loss_d = regression_loss(x1, x2, pos_mat=None, lambd=lambd, two_way=True,
                             mxu_dtype=jnp.bfloat16)
    jax.block_until_ready(loss_d)
    assert jnp.allclose(loss_d, ref_a, atol=2e-2, rtol=2e-2), (loss_d, ref_a)

    print("KERNEL_OK")
</pallas_src>

<mosaic_0001>
module attributes {stable_mosaic.version = 11 : i64} {
  func.func @_regression_kernel(%arg0: i32, %arg1: memref<8x32xf32, #tpu.memory_space<vmem>>, %arg2: memref<16x32xf32, #tpu.memory_space<vmem>>, %arg3: memref<1x1xf32, #tpu.memory_space<vmem>>, %arg4: memref<16x32xf32, #tpu.memory_space<vmem>>, %arg5: memref<1x1xf32, #tpu.memory_space<vmem>>, %arg6: memref<1x1xf32, #tpu.memory_space<vmem>>, %arg7: memref<1x1xf32, #tpu.memory_space<vmem>>) attributes {dimension_semantics = [#tpu.dimension_semantics<arbitrary>], iteration_bounds = array<i64: 2>, scalar_prefetch = 0 : i64, scratch_operands = 4 : i64, tpu.core_type = #tpu.core_type<tc>, window_params = [{transform_indices = @transform_0, window_bounds = array<i64: 8, 32>}, {pipeline_mode = #tpu.pipeline_mode<synchronous>, transform_indices = @transform_1, window_bounds = array<i64: 16, 32>}, {pipeline_mode = #tpu.pipeline_mode<synchronous>, transform_indices = @transform_2, window_bounds = array<i64: 1, 1>}]} {
    %c0_i32 = arith.constant 0 : i32
    %0 = arith.cmpi eq, %arg0, %c0_i32 : i32
    %1 = arith.extui %0 : i1 to i32
    %cst = arith.constant 1.000000e-24 : f32
    %c0_i32_0 = arith.constant 0 : i32
    %2 = arith.cmpi ne, %1, %c0_i32_0 : i32
    scf.if %2 {
      %c0_29 = arith.constant 0 : index
      %c0_30 = arith.constant 0 : index
      %46 = vector.load %arg2[%c0_29, %c0_30] : memref<16x32xf32, #tpu.memory_space<vmem>>, vector<16x32xf32>
      %47 = arith.mulf %46, %46 : vector<16x32xf32>
      %cst_31 = arith.constant dense<0.000000e+00> : vector<16xf32>
      %48 = vector.multi_reduction <add>, %47, %cst_31 [1] : vector<16x32xf32> to vector<16xf32>
      %49 = vector.shape_cast %48 : vector<16xf32> to vector<16x1xf32>
      %50 = vector.broadcast %cst : f32 to vector<16x1xf32>
      %51 = arith.maximumf %49, %50 : vector<16x1xf32>
      %52 = math.rsqrt %51 : vector<16x1xf32>
      %53 = vector.broadcast %52 : vector<16x1xf32> to vector<16x32xf32>
      %54 = arith.mulf %46, %53 : vector<16x32xf32>
      %c0_32 = arith.constant 0 : index
      %c0_33 = arith.constant 0 : index
      %55 = vector.load %arg4[%c0_32, %c0_33] : memref<16x32xf32, #tpu.memory_space<vmem>>, vector<16x32xf32>
      tpu.vector_store %arg4[%c0_32, %c0_33], %54 {strides = array<i32>} : memref<16x32xf32, #tpu.memory_space<vmem>>, vector<16x32xf32>,
      %cst_34 = arith.constant 0.000000e+00 : f32
      %56 = vector.broadcast %cst_34 : f32 to vector<1x1xf32>
      %c0_35 = arith.constant 0 : index
      %c0_36 = arith.constant 0 : index
      %57 = vector.load %arg5[%c0_35, %c0_36] : memref<1x1xf32, #tpu.memory_space<vmem>>, vector<1x1xf32>
      tpu.vector_store %arg5[%c0_35, %c0_36], %56 {strides = array<i32>} : memref<1x1xf32, #tpu.memory_space<vmem>>, vector<1x1xf32>,
      %cst_37 = arith.constant 0.000000e+00 : f32
      %58 = vector.broadcast %cst_37 : f32 to vector<1x1xf32>
      %c0_38 = arith.constant 0 : index
      %c0_39 = arith.constant 0 : index
      %59 = vector.load %arg6[%c0_38, %c0_39] : memref<1x1xf32, #tpu.memory_space<vmem>>, vector<1x1xf32>
      tpu.vector_store %arg6[%c0_38, %c0_39], %58 {strides = array<i32>} : memref<1x1xf32, #tpu.memory_space<vmem>>, vector<1x1xf32>,
      %cst_40 = arith.constant 0.000000e+00 : f32
      %60 = vector.broadcast %cst_40 : f32 to vector<1x1xf32>
      %c0_41 = arith.constant 0 : index
      %c0_42 = arith.constant 0 : index
      %61 = vector.load %arg7[%c0_41, %c0_42] : memref<1x1xf32, #tpu.memory_space<vmem>>, vector<1x1xf32>
      tpu.vector_store %arg7[%c0_41, %c0_42], %60 {strides = array<i32>} : memref<1x1xf32, #tpu.memory_space<vmem>>, vector<1x1xf32>,
    } else {
    }
    %c0 = arith.constant 0 : index
    %c0_1 = arith.constant 0 : index
    %3 = vector.load %arg1[%c0, %c0_1] : memref<8x32xf32, #tpu.memory_space<vmem>>, vector<8x32xf32>
    %4 = arith.mulf %3, %3 : vector<8x32xf32>
    %cst_2 = arith.constant dense<0.000000e+00> : vector<8xf32>
    %5 = vector.multi_reduction <add>, %4, %cst_2 [1] : vector<8x32xf32> to vector<8xf32>
    %6 = vector.shape_cast %5 : vector<8xf32> to vector<8x1xf32>
    %cst_3 = arith.constant 1.000000e-24 : f32
    %7 = vector.broadcast %cst_3 : f32 to vector<8x1xf32>
    %8 = arith.maximumf %6, %7 : vector<8x1xf32>
    %9 = math.rsqrt %8 : vector<8x1xf32>
    %10 = vector.broadcast %9 : vector<8x1xf32> to vector<8x32xf32>
    %11 = arith.mulf %3, %10 : vector<8x32xf32>
    %c0_4 = arith.constant 0 : index
    %c0_5 = arith.constant 0 : index
    %12 = vector.load %arg4[%c0_4, %c0_5] : memref<16x32xf32, #tpu.memory_space<vmem>>, vector<16x32xf32>
    %cst_6 = arith.constant dense<0.000000e+00> : vector<8x16xf32>
    %13 = tpu.matmul %11, %12, %cst_6 {dimension_numbers = #tpu.dot_dimension_numbers<[1], [1], [0], [0], [0, 0, 1, 0], [], []>} : vector<8x32xf32>, vector<16x32xf32>, vector<8x16xf32> -> vector<8x16xf32>
    %14 = arith.mulf %13, %13 : vector<8x16xf32>
    %cst_7 = arith.constant dense<0.000000e+00> : vector<8xf32>
    %15 = vector.multi_reduction <add>, %14, %cst_7 [1] : vector<8x16xf32> to vector<8xf32>
    %16 = vector.shape_cast %15 : vector<8xf32> to vector<8x1xf32>
    %c8_i32 = arith.constant 8 : i32
    %17 = arith.muli %arg0, %c8_i32 : i32
    %18 = tpu.assume_multiple %17, 8 : i32
    %19 = arith.index_cast %18 : i32 to index
    %c0_8 = arith.constant 0 : index
    %20 = vector.load %arg4[%19, %c0_8] : memref<16x32xf32, #tpu.memory_space<vmem>>, vector<8x32xf32>
    %21 = arith.mulf %11, %20 : vector<8x32xf32>
    %cst_9 = arith.constant dense<0.000000e+00> : vector<8xf32>
    %22 = vector.multi_reduction <add>, %21, %cst_9 [1] : vector<8x32xf32> to vector<8xf32>
    %23 = vector.shape_cast %22 : vector<8xf32> to vector<8x1xf32>
    %c0_10 = arith.constant 0 : index
    %c0_11 = arith.constant 0 : index
    %24 = vector.load %arg5[%c0_10, %c0_11] : memref<1x1xf32, #tpu.memory_space<vmem>>, vector<1x1xf32>
    %cst_12 = arith.constant 1.000000e+00 : f32
    %25 = vector.broadcast %cst_12 : f32 to vector<8x1xf32>
    %26 = arith.subf %23, %25 : vector<8x1xf32>
    %27 = arith.mulf %26, %26 : vector<8x1xf32>
    %cst_13 = arith.constant dense<0.000000e+00> : vector<1xf32>
    %28 = vector.multi_reduction <add>, %27, %cst_13 [0] : vector<8x1xf32> to vector<1xf32>
    %29 = vector.shape_cast %28 : vector<1xf32> to vector<1x1xf32>
    %30 = arith.addf %24, %29 : vector<1x1xf32>
    %c0_14 = arith.constant 0 : index
    %c0_15 = arith.constant 0 : index
    %31 = vector.load %arg5[%c0_14, %c0_15] : memref<1x1xf32, #tpu.memory_space<vmem>>, vector<1x1xf32>
    tpu.vector_store %arg5[%c0_14, %c0_15], %30 {strides = array<i32>} : memref<1x1xf32, #tpu.memory_space<vmem>>, vector<1x1xf32>,
    %c0_16 = arith.constant 0 : index
    %c0_17 = arith.constant 0 : index
    %32 = vector.load %arg6[%c0_16, %c0_17] : memref<1x1xf32, #tpu.memory_space<vmem>>, vector<1x1xf32>
    %33 = arith.mulf %23, %23 : vector<8x1xf32>
    %cst_18 = arith.constant dense<0.000000e+00> : vector<1xf32>
    %34 = vector.multi_reduction <add>, %33, %cst_18 [0] : vector<8x1xf32> to vector<1xf32>
    %35 = vector.shape_cast %34 : vector<1xf32> to vector<1x1xf32>
    %36 = arith.addf %32, %35 : vector<1x1xf32>
    %c0_19 = arith.constant 0 : index
    %c0_20 = arith.constant 0 : index
    %37 = vector.load %arg6[%c0_19, %c0_20] : memref<1x1xf32, #tpu.memory_space<vmem>>, vector<1x1xf32>
    tpu.vector_store %arg6[%c0_19, %c0_20], %36 {strides = array<i32>} : memref<1x1xf32, #tpu.memory_space<vmem>>, vector<1x1xf32>,
    %c0_21 = arith.constant 0 : index
    %c0_22 = arith.constant 0 : index
    %38 = vector.load %arg7[%c0_21, %c0_22] : memref<1x1xf32, #tpu.memory_space<vmem>>, vector<1x1xf32>
    %cst_23 = arith.constant dense<0.000000e+00> : vector<1xf32>
    %39 = vector.multi_reduction <add>, %16, %cst_23 [0] : vector<8x1xf32> to vector<1xf32>
    %40 = vector.shape_cast %39 : vector<1xf32> to vector<1x1xf32>
    %41 = arith.addf %38, %40 : vector<1x1xf32>
    %c0_24 = arith.constant 0 : index
    %c0_25 = arith.constant 0 : index
    %42 = vector.load %arg7[%c0_24, %c0_25] : memref<1x1xf32, #tpu.memory_space<vmem>>, vector<1x1xf32>
    tpu.vector_store %arg7[%c0_24, %c0_25], %41 {strides = array<i32>} : memref<1x1xf32, #tpu.memory_space<vmem>>, vector<1x1xf32>,
    %c1_i32 = arith.constant 1 : i32
    %43 = arith.cmpi eq, %arg0, %c1_i32 : i32
    %44 = arith.extui %43 : i1 to i32
    %cst_26 = arith.constant 1.600000e+01 : f32
    %cst_27 = arith.constant 5.000000e-01 : f32
    %c0_i32_28 = arith.constant 0 : i32
    %45 = arith.cmpi ne, %44, %c0_i32_28 : i32
    scf.if %45 {
      %c0_29 = arith.constant 0 : index
      %c0_30 = arith.constant 0 : index
      %46 = vector.load %arg5[%c0_29, %c0_30] : memref<1x1xf32, #tpu.memory_space<vmem>>, vector<1x1xf32>
      %47 = vector.broadcast %cst_26 : f32 to vector<1x1xf32>
      %48 = arith.divf %46, %47 : vector<1x1xf32>
      %c0_31 = arith.constant 0 : index
      %c0_32 = arith.constant 0 : index
      %49 = vector.load %arg7[%c0_31, %c0_32] : memref<1x1xf32, #tpu.memory_space<vmem>>, vector<1x1xf32>
      %c0_33 = arith.constant 0 : index
      %c0_34 = arith.constant 0 : index
      %50 = vector.load %arg6[%c0_33, %c0_34] : memref<1x1xf32, #tpu.memory_space<vmem>>, vector<1x1xf32>
      %51 = arith.subf %49, %50 : vector<1x1xf32>
      %cst_35 = arith.constant 1.000000e+00 : f32
      %52 = arith.subf %cst_26, %cst_35 : f32
      %53 = arith.mulf %cst_26, %52 : f32
      %54 = vector.broadcast %53 : f32 to vector<1x1xf32>
      %55 = arith.divf %51, %54 : vector<1x1xf32>
      %56 = vector.broadcast %cst_27 : f32 to vector<1x1xf32>
      %57 = arith.mulf %56, %55 : vector<1x1xf32>
      %58 = arith.addf %48, %57 : vector<1x1xf32>
      %c0_36 = arith.constant 0 : index
      %c0_37 = arith.constant 0 : index
      %59 = vector.load %arg3[%c0_36, %c0_37] : memref<1x1xf32, #tpu.memory_space<vmem>>, vector<1x1xf32>
      tpu.vector_store %arg3[%c0_36, %c0_37], %58 {strides = array<i32>} : memref<1x1xf32, #tpu.memory_space<vmem>>, vector<1x1xf32>,
    } else {
    }
    return
  }
  func.func @transform_0(%arg0: i32) -> (i32, i32) {
    %c0_i32 = arith.constant 0 : i32
    %c0_i32_0 = arith.constant 0 : i32
    return %arg0, %c0_i32 : i32, i32
  }
  func.func @transform_1(%arg0: i32) -> (i32, i32) {
    %c0_i32 = arith.constant 0 : i32
    %c0_i32_0 = arith.constant 0 : i32
    %c0_i32_1 = arith.constant 0 : i32
    return %c0_i32, %c0_i32_0 : i32, i32
  }
  func.func @transform_2(%arg0: i32) -> (i32, i32) {
    %c0_i32 = arith.constant 0 : i32
    %c0_i32_0 = arith.constant 0 : i32
    %c0_i32_1 = arith.constant 0 : i32
    return %c0_i32, %c0_i32_0 : i32, i32
  }
}

</mosaic_0001>

<bundles_post_ra>
// kernel: tpu_custom_call.1
= control target key start
LH: loop header
LB: loop body
LE: loop exit
PB: predicated region body
PF: predicated region fallthrough
CT: control target
= control target key end

     0   :  { %7 = vsyncpa [#allocation7], 0  ;;  %s796_s0 = inlined_call_operand.hbm [shape: f32[16,32], index: 0, kind: input, shape index: {}]   ;;  %s797_s1 = inlined_call_operand.hbm [shape: f32[16,32], index: 1, kind: input, shape index: {}]   ;;  %s798_s2 = inlined_call_operand.hbm [shape: f32[1,1], index: 2, kind: output, shape index: {}]  }
   0x1   :  { %9 = vsyncpa [#allocation7 + $0x1], 0 }
   0x2   :  { %10 = vsyncpa [#allocation10], 0 }
   0x3   :  { %11 = vsyncpa [#allocation8], 0  ;;  %s649_s9 = smov 0   ;;  %s651_s10 = smov 0  }
   0x4   :  { %s653_s11 = smov 0   ;;  %s655_s12 = smov 0  }
   0x5 LB: > { %s668_s13 = sadd.s32 4294967295, %s624_s12   ;;  %p37_p0 = scmp.ne.s32.totalorder %s616_s10, %s612_s9  ;;  %s624_s12 = sphi %s655_s12, %s814_s12   ;;  %s620_s11 = sphi %s653_s11, %s813_s11   ;;  %s616_s10 = sphi %s651_s10, %s812_s10   ;;  %s612_s9 = sphi %s649_s9, %s811_s9  }
   0x6   : > { %p799_p1 = scmp.eq.s32.totalorder %s668_s13, 0  ;;  %p407_p2 = scmp.ge.s32.totalorder %s624_s12, 1 }
   0x7   : > { %p90_p3 = scmp.lt.s32.totalorder %s624_s12, 3  ;;  %s626_s16 = smov [#allocation9]  }
   0x8   : > { %p677_p5 = por %p799_p1, %p37_p0  ;;  %s102_s17 = sshll.u32 %s626_s16, 4  ;;  %s103_s17 = int_to_ptr.vmem [resolvable:$true] %s102_s17 }
   0x9   : > { %p681_p6 = pnand %p407_p2, %p90_p3  ;;  %s694_s19 = sadd.s32 1, %s624_s12  }
   0xa   : > { %s802_s14 = scalar_select %p677_p5, 1, 0 }
   0xb   : > { %s803_s15 = scalar_select %p681_p6, 1, 0 }
   0xc   : > { %p446_p7 = pneg %p681_p6  ;;  %s24_s20 = sadd.s32 1, %s620_s11 }
   0xd   : > { %s21_s21 = ssub.s32 %s624_s12, %s694_s19  ;;  %s515_s22 = scalar_lea.vmem %s103_s17, 256 }
   0xe   : > { %p689_p8 = pnand %p446_p7, %p799_p1  ;;  %p516_p10 = scmp.ne.s32.totalorder %s103_s17, %s515_s22 }
   0xf   : > { %p523_p13 = scmp.lt.s32.totalorder %s103_s17, %s103_s17  ;;  %p524_p0 = scmp.lt.s32.totalorder %s515_s22, %s515_s22 }
  0x10   : > { %p506_p9 = pneg %p689_p8 }
  0x11   : > { %p525_p2 = por %p524_p0, %p523_p13 }
  0x12   : > { %p518_p11 = pnand %p516_p10, %p506_p9 }
  0x14   : > { %p519_p12 = pneg %p518_p11 }
  0x16   : > { %p526_p3 = pnand %p525_p2, %p519_p12 }
  0x18   : > { %529 = shalt.err (!%p526_p3)
}
  0x19   : > { %s627_s23 = smov 128   ;;  %s628_s24 = smov 8  }
  0x1a   : > { %449 = dma.hbm_to_vmem [thread:$0]  (!%p689_p8), %s797_s1, 256, %s103_s17, [#allocation10], %s627_s23, %s627_s23, %s628_s24  }
  0x1b   : > { %p22_p7 = scmp.eq.s32.totalorder %s21_s21, 0  ;;  %p31_p9 = scmp.ne.s32.totalorder %s620_s11, %s616_s10 }
  0x1c   : > { %p32_p10 = scmp.eq.s32.totalorder %s624_s12, 0  ;;  %p455_p11 = scmp.lt.s32.totalorder %s624_s12, 2 }
  0x1d   : > { %s711_s27 = scalar_select %p22_p7, %s620_s11, %s24_s20  }
  0x1e   : > { %p33_p12 = por %p32_p10, %p31_p9  ;;  %s116_s28 = sand.u32 1, %s620_s11  }
  0x1f   : > { %s410_s29 = sshll.u32 %s116_s28, 3  ;;  %s411_s30 = sshll.u32 %s624_s12, 7 }
  0x20   : > { %s718_s5 = scalar_lea.hbm %s796_s0, %s411_s30  ;;  %s120_s6 = scalar_lea.vmem [#allocation6], %s410_s29 }
  0x21   : > { %s127_s7 = sshll.u32 %s120_s6, 4  ;;  %p720_p8 = pnand %p455_p11, %p33_p12  ;;  %s128_s7 = int_to_ptr.vmem [resolvable:$true] %s127_s7 }
  0x22   : > { %s117_s9 = scalar_lea.sflag [#allocation7], %s116_s28  ;;  %s530_s16 = scalar_lea.hbm %s718_s5, 128 }
  0x23   : > { %p531_p13 = scmp.ne.s32.totalorder %s718_s5, %s530_s16  ;;  %p532_p0 = pneg %p720_p8 }
  0x24   : > { %s535_s18 = scalar_lea.hbm %s796_s0, 256  ;;  %p536_p7 = scmp.lt.s32.totalorder %s718_s5, %s796_s0 }
  0x25   : > { %p533_p2 = pnand %p532_p0, %p531_p13  ;;  %p537_p9 = scmp.lt.s32.totalorder %s535_s18, %s530_s16 }
  0x27   : > { %p534_p3 = pneg %p533_p2  ;;  %p538_p10 = por %p537_p9, %p536_p7 }
  0x29   : > { %p539_p11 = pnand %p538_p10, %p534_p3 }
  0x2b   : > { %542 = shalt.err (!%p539_p11)
}
  0x2c   : > { %s543_s22 = scalar_lea.vmem %s128_s7, 128  ;;  %s629_s23 = smov [#allocation6]  }
  0x2d   : > { %p544_p12 = scmp.ne.s32.totalorder %s128_s7, %s543_s22  ;;  %s548_s24 = sshll.u32 %s629_s23, 4  ;;  %s549_s24 = int_to_ptr.vmem [resolvable:$false] %s548_s24 }
  0x2e   : > { %s550_s25 = scalar_lea.vmem %s549_s24, 256  ;;  %p551_p13 = scmp.lt.s32.totalorder %s128_s7, %s549_s24 }
  0x2f   : > { %p546_p4 = pnand %p544_p12, %p532_p0  ;;  %p552_p2 = scmp.lt.s32.totalorder %s550_s25, %s543_s22 }
  0x31   : > { %p547_p1 = pneg %p546_p4  ;;  %p553_p5 = por %p552_p2, %p551_p13 }
  0x33   : > { %p554_p6 = pnand %p553_p5, %p547_p1 }
  0x35   : > { %557 = shalt.err (!%p554_p6)
}
  0x36   : > { %453 = dma.hbm_to_vmem [thread:$0]  (!%p720_p8), %s718_s5, 128, %s128_s7, %s117_s9  }
  0x37   : > { %p806_p3 = scmp.ne.s32.totalorder %s803_s15, 0 }
  0x38   : > { %s138_s26 = sand.u32 (!%p806_p3), 1, %s616_s10   ;;  %p807_p4 = scmp.ne.s32.totalorder (!%p806_p3), %s802_s14, 0 }
  0x39   : > { %136 = sbr.rel (%p806_p3) target bundleno = 778 (0x30a), region = 28  ;;  %s741_s28 = sshll.u32 (!%p806_p3), %s138_s26, 3 }
  0x3a   : > { %s139_s29 = scalar_lea.sflag (!%p806_p3), [#allocation7], %s138_s26  ;;  %s142_s30 = scalar_lea.vmem (!%p806_p3), [#allocation6], %s741_s28 }
  0x3e   : > { %599 = dma.done.wait (%p807_p4), %s139_s29, 128  }
  0x3f   : > { %601 = vsyncadd (%p807_p4), %s139_s29, 4294967168  ;;  %p808_p1 = scmp.eq.s32.totalorder %s668_s13, 0 }
  0x41   : > { %603 = dma.done.wait (%p808_p1), [#allocation10], 256   ;;  %p809_p5 = pmov %p808_p1 }
  0x42   : > { %p810_p6 = scmp.ne.s32.totalorder %s668_s13, 0 }
  0x43   : > { %605 = vsyncadd (%p809_p5), [#allocation10], 4294967040 }
  0x44   : > { %165 = sbr.rel (%p810_p6) target bundleno = 238 (0xee), region = 40 }
  0x49   : > { %v166_v0 = vld [vmem:[#allocation9] sm:$0xff]  ;;  %vm170_vm0 = vcmask 261120   ;;  %v167_v1 = vld [vmem:[#allocation9 + $0x8] sm:$0xff]  ;;  %vm185_vm1 = vcmask 0   ;;  %v630_v6 = vmov 0.0  }
  0x4a   : > { %v168_v2 = vmul.f32 %v166_v0, %v166_v0  ;;  %v169_v3 = vmul.f32 %v167_v1, %v167_v1  ;;  %186 = vst.msk [vmem:[#allocation3] sm:$0x1] %vm185_vm1, %v630_v6  ;;  %187 = vst.msk [vmem:[#allocation4] sm:$0x1] %vm185_vm1, %v630_v6 }
  0x4b   : > { %188 = vst.msk [vmem:[#allocation5] sm:$0x1] %vm185_vm1, %v630_v6 }
  0x4c   : > { %v171_v4 = vsel %vm170_vm0, %v168_v2, 0.0  ;;  %v174_v5 = vsel %vm170_vm0, %v169_v3, 0.0 }
  0x4d   : > { %172 = vadd.xlane.f32.xlu0 %v171_v4 }
  0x51   : > { %175 = vadd.xlane.f32.xlu0 %v174_v5 }
  0xd6   : > { %v173_v7 = vpop.xlane.xlu0 %172 }
  0xd7   : > { %v177_v8 = vmax.f32 %v173_v7, 1e-24 }
  0xd9   : > { %498 = vrsqrt.f32 %v177_v8 }
  0xda   : > { %v176_v9 = vpop.xlane.xlu0 %175 }
  0xdb   : > { %v178_v10 = vmax.f32 %v176_v9, 1e-24 }
  0xdd   : > { %500 = vrsqrt.f32 %v178_v10 }
  0xe6   : > { %v499_v11 = vpop.eup %498 }
  0xe7   : > { %v181_v12 = vmul.f32 %v499_v11, %v166_v0 }
  0xe9   : > { %183 = vst.msk [vmem:[#allocation2] sm:$0xff] %vm170_vm0, %v181_v12 }
  0xea   : > { %v501_v13 = vpop.eup %500 }
  0xeb   : > { %v182_v14 = vmul.f32 %v501_v13, %v167_v1 }
  0xed   : > { %184 = vst.msk [vmem:[#allocation2 + $0x8] sm:$0xff] %vm170_vm0, %v182_v14 }
  0xee PF: > { %v189_v15 = vld [vmem:[%s142_s30] sm:$0xff]  ;;  %vm191_vm2 = vcmask 261120   ;;  %v631_v19 = vmov 0.0   ;;  %vm632_vm3 = vmmov 0   ;;  %s419_s14 = sshll.u32 %s668_s13, 3  ;;  %vm301_vm4 = vcmask 0  }
  0xef   : > { %v190_v16 = vmul.f32 %v189_v15, %v189_v15  ;;  %429 = vmatprep.subr.mxu0 %v631_v19  ;;  %433 = vmatprep.mubr.msk.f32.mxu0 %vm632_vm3, %v631_v19  ;;  %s285_s15 = scalar_lea.vmem [#allocation2], %s419_s14  ;;  %v303_v41 = vld [vmem:[#allocation4] sm:$0x1]  ;;  %v291_v44 = vld [vmem:[#allocation3] sm:$0x1]  ;;  %vm280_vm5 = vcmask 130048  }
  0xf0   : > { %v198_v20 = vld [vmem:[#allocation2] sm:$0xff]  ;;  %v313_v58 = vld [vmem:[#allocation5] sm:$0x1]  ;;  %p421_p8 = scmp.ne.s32.totalorder %s668_s13, 1 }
  0xf1   : > { %v192_v17 = vsel %vm191_vm2, %v190_v16, 0.0 }
  0xf2   : > { %193 = vadd.xlane.f32.xlu0 %v192_v17 }
  0xf4   : > { %v199_v18 = vld [vmem:[#allocation2 + $0x8] sm:$0xff]  ;;  %v286_v24 = vld [vmem:[%s285_s15] sm:$0xff] }
  0xf5   : > { %430 = vmatpush3.xpose.msk.msra.mxu0 %vm191_vm2, %v199_v18 }
  0xf6   : > { %431 = vmatprep.subr.mxu0 %v631_v19 }
  0xf9   : > { %432 = vmatpush3.xpose.msk.msra.mxu0 %vm191_vm2, %v198_v20 }
 0x17b   : > { %v194_v21 = vpop.xlane.xlu0 %193 }
 0x17c   : > { %v195_v22 = vmax.f32 %v194_v21, 1e-24 }
 0x17e   : > { %502 = vrsqrt.f32 %v195_v22 }
 0x18b   : > { %v503_v23 = vpop.eup %502 }
 0x18c   : > { %v197_v25 = vmul.f32 %v503_v23, %v189_v15 }
 0x18e   : > { %434 = vmatmul.mubr.msk.f32.vlgmr.msra.gmra.mxu0 %vm191_vm2, %v197_v25  ;;  %v287_v26 = vmul.f32 %v286_v24, %v197_v25 }
 0x190   : > { %v288_v27 = vsel %vm191_vm2, %v287_v26, 0.0 }
 0x191   : > { %289 = vadd.xlane.f32.xlu0 %v288_v27 }
 0x21a   : > { %v290_v28 = vpop.xlane.xlu0 %289 }
 0x21b   : > { %v420_v29 = vadd.f32 -1.0, %v290_v28  ;;  %v304_v30 = vmul.f32 %v290_v28, %v290_v28 }
 0x21d   : > { %v293_v31 = vmul.f32 %v420_v29, %v420_v29  ;;  %v305_v32 = vrot.slane %v304_v30, 4 }
 0x21f   : > { %v294_v33 = vrot.slane %v293_v31, 4  ;;  %v306_v34 = vadd.f32 %v305_v32, %v304_v30 }
 0x221   : > { %v295_v35 = vadd.f32 %v294_v33, %v293_v31  ;;  %v307_v36 = vrot.slane %v306_v34, 2 }
 0x223   : > { %v296_v37 = vrot.slane %v295_v35, 2  ;;  %v308_v38 = vadd.f32 %v307_v36, %v306_v34 }
 0x225   : > { %v297_v39 = vadd.f32 %v296_v37, %v295_v35  ;;  %v309_v40 = vrot.slane %v308_v38, 1 }
 0x227   : > { %v298_v42 = vrot.slane %v297_v39, 1  ;;  %v310_v43 = vadd.f32 %v309_v40, %v308_v38 }
 0x229   : > { %v299_v45 = vadd.f32 %v298_v42, %v297_v39  ;;  %v311_v46 = vadd.f32 %v310_v43, %v303_v41 }
 0x22b   : > { %v300_v47 = vadd.f32 %v299_v45, %v291_v44  ;;  %312 = vst.msk [vmem:[#allocation4] sm:$0x1] %vm301_vm4, %v311_v46 }
 0x22d   : > { %302 = vst.msk [vmem:[#allocation3] sm:$0x1] %vm301_vm4, %v300_v47 }
 0x24e   : > { %v275_v48 = vpop.f32.mrf.mxu0 }
 0x24f   : > { %v279_v49 = vmul.f32 %v275_v48, %v275_v48 }
 0x250   : > { %v435_v50 = vpop.f32.mrf.mxu0 }
 0x251   : > { %v281_v51 = vsel %vm280_vm5, %v279_v49, 0.0 }
 0x252   : > { %282 = vadd.xlane.f32.xlu1 %v281_v51 }
 0x2db   : > { %v283_v52 = vpop.xlane.xlu1 %282 }
 0x2dc   : > { %v314_v53 = vrot.slane %v283_v52, 4 }
 0x2de   : > { %v315_v54 = vadd.f32 %v314_v53, %v283_v52 }
 0x2e0   : > { %v316_v55 = vrot.slane %v315_v54, 2 }
 0x2e2   : > { %v317_v56 = vadd.f32 %v316_v55, %v315_v54 }
 0x2e4   : > { %v318_v57 = vrot.slane %v317_v56, 1 }
 0x2e6   : > { %v319_v59 = vadd.f32 %v318_v57, %v317_v56  ;;  %325 = sbr.rel (%p421_p8) target bundleno = 763 (0x2fb), region = 44 }
 0x2e8   : > { %v320_v60 = vadd.f32 %v319_v59, %v313_v58 }
 0x2ea   : > { %321 = vst.msk [vmem:[#allocation5] sm:$0x1] %vm301_vm4, %v320_v60 }
 0x2eb   : > { %v326_v61 = vld [vmem:[#allocation3] sm:$0x1]  ;;  %v330_v63 = vld [vmem:[#allocation4] sm:$0x1] }
 0x2ec   : > { %v328_v1 = vmul.f32 0.0625, %v326_v61 }
 0x2f1   : > { %v329_v62 = vld [vmem:[#allocation5] sm:$0x1] }
 0x2f2   : > { %v331_v0 = vsub.f32 %v329_v62, %v330_v63 }
 0x2f4   : > { %v333_v2 = vmul.f32 0.004166667, %v331_v0 }
 0x2f6   : > { %v334_v3 = vmul.f32 0.5, %v333_v2 }
 0x2f8   : > { %v335_v4 = vadd.f32 %v334_v3, %v328_v1 }
 0x2fa   : > { %336 = vst.msk [vmem:[#allocation11] sm:$0x1] %vm301_vm4, %v335_v4 }
 0x2fb PF: > { %p457_p0 = scmp.eq.s32.totalorder %s668_s13, 1  ;;  %s633_s3 = smov [#allocation11]  }
 0x2fc   : > { %s344_s4 = sshll.u32 %s633_s3, 4  ;;  %s345_s4 = int_to_ptr.vmem [resolvable:$true] %s344_s4 }
 0x2fd   : > { %s558_s5 = scalar_lea.vmem %s345_s4, 16  ;;  %s564_s6 = scalar_lea.vmem %s345_s4, 32 }
 0x2fe   : > { %p559_p7 = scmp.ne.s32.totalorder %s345_s4, %s558_s5  ;;  %p565_p11 = scmp.lt.s32.totalorder %s345_s4, %s345_s4 }
 0x2ff   : > { %p566_p12 = scmp.lt.s32.totalorder %s564_s6, %s558_s5 }
 0x300   : > { %p560_p9 = pnand %p559_p7, %p457_p0 }
 0x301   : > { %p567_p13 = por %p566_p12, %p565_p11 }
 0x302   : > { %p561_p10 = pneg %p560_p9 }
 0x304   : > { %p568_p2 = pnand %p567_p13, %p561_p10 }
 0x306   : > { %571 = shalt.err (!%p568_p2)
}
 0x307   : > { %443 = dma.vmem_to_hbm [thread:$0]  (%p457_p0), %s345_s4, 16, %s798_s2, [#allocation8]  }
 0x308   : > { %607 = dma.done.wait (%p457_p0), [#allocation8], 16  }
 0x309   : > { %609 = vsyncadd (%p457_p0), [#allocation8], 4294967280 }
 0x30a PF: > { %p14_p3 = scmp.ge.s32.totalorder %s694_s19, 4   ;;  %s811_s9 = smov %s616_s10 }
 0x30b   : > { %s812_s10 = smov %s620_s11  ;;  %s813_s11 = smov %s711_s27 }
 0x30c   : > { %s814_s12 = smov %s694_s19  ;;  %16 = sbr.rel (!%p14_p3) target bundleno = 5 (0x5), region = 78 }
 0x311   :  { %357 = vsyncpa [#allocation7], 1 }
 0x312   :  { %359 = vsyncpa [#allocation7 + $0x1], 1 }
 0x313   :  { %360 = vsyncpa [#allocation10], 1 }
 0x314   :  { %361 = vsyncpa [#allocation8], 1 }
 0x315   :  { %363 = vsyncpa [#allocation8 + $0x1], 1 }

</bundles_post_ra>
